<compile_context>
chip_gen: v6e
topology: v6e:2x2x1
jax: 0.10.0
libtpu: 0.0.40
codegen_flags: <defaults>
</compile_context>

<pallas_src>
import jax
import jax.numpy as jnp
from jax.experimental import pallas as pl
from jax.experimental.pallas import tpu as pltpu

N_COMPONENTS = 100
H1, H2, N_OUT = 64, 32, 10
PAD = 128              # common padded feature width (lane dim)
BIAS_ROWS = 8          # bias slab sublane-padded to 8 rows


def _round_up(x, m):
    return ((x + m - 1) // m) * m


def _pad2d(a, rows, cols):
    return jnp.pad(a, ((0, rows - a.shape[0]), (0, cols - a.shape[1])))


def mlp_kernel(x_ref, w_ref, b_ref, out_ref):
    """x_ref: [TB,100] f32, w_ref: [384,128] bf16, b_ref: [8,128] f32, out_ref: [TB,128] bf16."""
    # Cast in VMEM (no wrapper-side HBM pass). First matmul contracts over K=100
    # directly; Mosaic masks the K remainder, and rows 100..127 of the stored w1
    # block are zero anyway.
    x = x_ref[...].astype(jnp.bfloat16)               # bf16 [TB, 100]
    w1 = w_ref[0:N_COMPONENTS, :]                     # bf16 [100, 128]
    w2 = w_ref[1 * PAD:2 * PAD, :]                    # bf16 [128, 128]
    w3 = w_ref[2 * PAD:3 * PAD, :]                    # bf16 [128, 128]
    b1 = b_ref[0:1, :]                                # f32  [1, 128]
    b2 = b_ref[1:2, :]
    b3 = b_ref[2:3, :]

    # bf16 MXU matmuls with f32 accumulation; bias-add / ReLU kept in f32.
    h1 = jnp.dot(x, w1, preferred_element_type=jnp.float32) + b1
    h1 = jnp.maximum(h1, 0.0)

    h2 = jnp.dot(h1.astype(jnp.bfloat16), w2, preferred_element_type=jnp.float32) + b2
    h2 = jnp.maximum(h2, 0.0)

    y = jnp.dot(h2.astype(jnp.bfloat16), w3, preferred_element_type=jnp.float32) + b3
    out_ref[...] = y.astype(out_ref.dtype)            # bf16 lane-dense store


def pack_params(params):
    """Pack the 6 weight/bias arrays into one lane-dense bf16 weight slab and one
    f32 bias slab. Zero padding preserves the math: padded output lanes stay zero
    through bias-add and ReLU at every layer."""
    w_slab = jnp.concatenate(
        [_pad2d(params["w1"], PAD, PAD),
         _pad2d(params["w2"], PAD, PAD),
         _pad2d(params["w3"], PAD, PAD)], axis=0).astype(jnp.bfloat16)   # [384, 128]
    b_slab = jnp.zeros((BIAS_ROWS, PAD), jnp.float32)                    # [8, 128]
    b_slab = b_slab.at[0, :H1].set(params["b1"][0])
    b_slab = b_slab.at[1, :H2].set(params["b2"][0])
    b_slab = b_slab.at[2, :N_OUT].set(params["b3"][0])
    return w_slab, b_slab


def simple_net_forward_padded(x, w_slab, b_slab, *, tile_b=2048):
    """x: [B, 100] f32 -> padded bf16 logits [B_pad, 128].
    Only rows < B and columns < 10 are meaningful; padded rows contain garbage
    (ReLU(bias) propagated) and must not be consumed."""
    B = x.shape[0]
    B_pad = _round_up(B, 8)                 # pad rows only to sublane granularity, not to TB
    if B_pad != B:
        x = jnp.pad(x, ((0, B_pad - B), (0, 0)))

    TB = min(_round_up(tile_b, 8), B_pad)
    # v7x: make sure the 'parallel' batch axis has >=2 steps for big batches so
    # both TensorCores get work (also keeps per-step VMEM modest on v5e).
    if B_pad >= 256 and pl.cdiv(B_pad, TB) < 2:
        TB = _round_up(pl.cdiv(B_pad, 2), 8)
    grid = (pl.cdiv(B_pad, TB),)            # ragged last block allowed; OOB rows discarded

    flops = 2 * B_pad * (N_COMPONENTS * PAD + PAD * PAD + PAD * PAD)
    bytes_accessed = (B_pad * N_COMPONENTS * 4          # x read (f32)
                      + 3 * PAD * PAD * 2                # weight slab (bf16, once)
                      + BIAS_ROWS * PAD * 4              # bias slab (f32, once)
                      + B_pad * PAD * 2)                 # bf16 output write

    out = pl.pallas_call(
        mlp_kernel,
        out_shape=jax.ShapeDtypeStruct((B_pad, PAD), jnp.bfloat16),
        grid=grid,
        in_specs=[
            pl.BlockSpec((TB, N_COMPONENTS), lambda i: (i, 0)),   # x tile: pipelined, raw f32
            pl.BlockSpec((3 * PAD, PAD), lambda i: (0, 0)),       # weight slab: DMA'd once
            pl.BlockSpec((BIAS_ROWS, PAD), lambda i: (0, 0)),     # bias slab: DMA'd once
        ],
        out_specs=pl.BlockSpec((TB, PAD), lambda i: (i, 0)),      # 128-lane dense bf16 write
        compiler_params=pltpu.CompilerParams(
            dimension_semantics=("parallel",),                    # v7x: shard batch over 2 TCs
            vmem_limit_bytes=32 * 1024 * 1024),                   # headroom for TB=2048 on v5e
        cost_estimate=pl.CostEstimate(
            flops=flops, transcendentals=0, bytes_accessed=bytes_accessed),
    )(x, w_slab, b_slab)

    return out


def simple_net_forward(x, w_slab, b_slab, *, tile_b=2048):
    """Convenience wrapper matching SimpleNet.forward: [B,100] f32 -> [B,10] f32.
    Perf-sensitive consumers should use simple_net_forward_padded() and slice /
    consume the padded bf16 output lazily instead of paying this extra pass."""
    B = x.shape[0]
    out = simple_net_forward_padded(x, w_slab, b_slab, tile_b=tile_b)
    return out[:B, :N_OUT].astype(jnp.float32)


def init_params(key):
    """Deterministic init matching PyTorch nn.Linear default (uniform +/- 1/sqrt(fan_in)).
    Weights stored transposed: [in_features, out_features] so forward is x @ W + b."""
    def linear(key, fan_in, fan_out):
        kw, kb = jax.random.split(key)
        bound = 1.0 / jnp.sqrt(fan_in)
        w = jax.random.uniform(kw, (fan_in, fan_out), jnp.float32, -bound, bound)
        b = jax.random.uniform(kb, (1, fan_out), jnp.float32, -bound, bound)
        return w, b

    k1, k2, k3 = jax.random.split(key, 3)
    w1, b1 = linear(k1, N_COMPONENTS, H1)
    w2, b2 = linear(k2, H1, H2)
    w3, b3 = linear(k3, H2, N_OUT)
    return {"w1": w1, "b1": b1, "w2": w2, "b2": b2, "w3": w3, "b3": b3}


if __name__ == "__main__":
    key = jax.random.PRNGKey(0)
    k_params, k_x = jax.random.split(key)

    params = init_params(k_params)
    w_slab, b_slab = pack_params(params)   # packed once; VMEM-resident inside the kernel

    batch = 8
    x = jax.random.normal(k_x, (batch, N_COMPONENTS), jnp.float32)

    out = simple_net_forward(x, w_slab, b_slab)
    out = jax.block_until_ready(out)

    # Sanity check vs. plain-JAX f32 reference (loose tol: bf16 MXU operands + bf16 output).
    ref = jnp.maximum(x @ params["w1"] + params["b1"], 0.0)
    ref = jnp.maximum(ref @ params["w2"] + params["b2"], 0.0)
    ref = ref @ params["w3"] + params["b3"]
    assert out.shape == (batch, N_OUT)
    assert jnp.allclose(out, ref, atol=5e-2, rtol=5e-2), float(jnp.max(jnp.abs(out - ref)))

    print("KERNEL_OK")
</pallas_src>

<mosaic_0001>
module attributes {stable_mosaic.version = 11 : i64} {
  func.func @mlp_kernel(%arg0: i32, %arg1: memref<8x100xf32, #tpu.memory_space<vmem>>, %arg2: memref<384x128xbf16, #tpu.memory_space<vmem>>, %arg3: memref<8x128xf32, #tpu.memory_space<vmem>>, %arg4: memref<8x128xbf16, #tpu.memory_space<vmem>>) attributes {dimension_semantics = [#tpu.dimension_semantics<parallel>], iteration_bounds = array<i64: 1>, scalar_prefetch = 0 : i64, scratch_operands = 0 : i64, tpu.core_type = #tpu.core_type<tc>, window_params = [{transform_indices = @transform_0, window_bounds = array<i64: 8, 100>}, {pipeline_mode = #tpu.pipeline_mode<synchronous>, transform_indices = @transform_1, window_bounds = array<i64: 384, 128>}, {pipeline_mode = #tpu.pipeline_mode<synchronous>, transform_indices = @transform_2, window_bounds = array<i64: 8, 128>}, {transform_indices = @transform_3, window_bounds = array<i64: 8, 128>}]} {
    %c0 = arith.constant 0 : index
    %c0_0 = arith.constant 0 : index
    %0 = vector.load %arg1[%c0, %c0_0] : memref<8x100xf32, #tpu.memory_space<vmem>>, vector<8x100xf32>
    %1 = arith.truncf %0 : vector<8x100xf32> to vector<8x100xbf16>
    %c0_1 = arith.constant 0 : index
    %c0_2 = arith.constant 0 : index
    %2 = vector.load %arg2[%c0_1, %c0_2] : memref<384x128xbf16, #tpu.memory_space<vmem>>, vector<100x128xbf16>
    %c128 = arith.constant 128 : index
    %c0_3 = arith.constant 0 : index
    %3 = vector.load %arg2[%c128, %c0_3] : memref<384x128xbf16, #tpu.memory_space<vmem>>, vector<128x128xbf16>
    %c256 = arith.constant 256 : index
    %c0_4 = arith.constant 0 : index
    %4 = vector.load %arg2[%c256, %c0_4] : memref<384x128xbf16, #tpu.memory_space<vmem>>, vector<128x128xbf16>
    %c0_5 = arith.constant 0 : index
    %c0_6 = arith.constant 0 : index
    %5 = vector.load %arg3[%c0_5, %c0_6] : memref<8x128xf32, #tpu.memory_space<vmem>>, vector<1x128xf32>
    %c1 = arith.constant 1 : index
    %c0_7 = arith.constant 0 : index
    %6 = vector.load %arg3[%c1, %c0_7] : memref<8x128xf32, #tpu.memory_space<vmem>>, vector<1x128xf32>
    %c2 = arith.constant 2 : index
    %c0_8 = arith.constant 0 : index
    %7 = vector.load %arg3[%c2, %c0_8] : memref<8x128xf32, #tpu.memory_space<vmem>>, vector<1x128xf32>
    %cst = arith.constant dense<0.000000e+00> : vector<8x128xf32>
    %8 = tpu.matmul %1, %2, %cst {dimension_numbers = #tpu.dot_dimension_numbers<[1], [0], [0], [1], [0, 0, 1, 1], [], []>} : vector<8x100xbf16>, vector<100x128xbf16>, vector<8x128xf32> -> vector<8x128xf32>
    %9 = vector.broadcast %5 : vector<1x128xf32> to vector<8x128xf32>
    %10 = arith.addf %8, %9 : vector<8x128xf32>
    %cst_9 = arith.constant 0.000000e+00 : f32
    %11 = vector.broadcast %cst_9 : f32 to vector<8x128xf32>
    %12 = arith.maximumf %10, %11 : vector<8x128xf32>
    %13 = arith.truncf %12 : vector<8x128xf32> to vector<8x128xbf16>
    %cst_10 = arith.constant dense<0.000000e+00> : vector<8x128xf32>
    %14 = tpu.matmul %13, %3, %cst_10 {dimension_numbers = #tpu.dot_dimension_numbers<[1], [0], [0], [1], [0, 0, 1, 1], [], []>} : vector<8x128xbf16>, vector<128x128xbf16>, vector<8x128xf32> -> vector<8x128xf32>
    %15 = vector.broadcast %6 : vector<1x128xf32> to vector<8x128xf32>
    %16 = arith.addf %14, %15 : vector<8x128xf32>
    %cst_11 = arith.constant 0.000000e+00 : f32
    %17 = vector.broadcast %cst_11 : f32 to vector<8x128xf32>
    %18 = arith.maximumf %16, %17 : vector<8x128xf32>
    %19 = arith.truncf %18 : vector<8x128xf32> to vector<8x128xbf16>
    %cst_12 = arith.constant dense<0.000000e+00> : vector<8x128xf32>
    %20 = tpu.matmul %19, %4, %cst_12 {dimension_numbers = #tpu.dot_dimension_numbers<[1], [0], [0], [1], [0, 0, 1, 1], [], []>} : vector<8x128xbf16>, vector<128x128xbf16>, vector<8x128xf32> -> vector<8x128xf32>
    %21 = vector.broadcast %7 : vector<1x128xf32> to vector<8x128xf32>
    %22 = arith.addf %20, %21 : vector<8x128xf32>
    %23 = arith.truncf %22 : vector<8x128xf32> to vector<8x128xbf16>
    %c0_13 = arith.constant 0 : index
    %c0_14 = arith.constant 0 : index
    %24 = vector.load %arg4[%c0_13, %c0_14] : memref<8x128xbf16, #tpu.memory_space<vmem>>, vector<8x128xbf16>
    tpu.vector_store %arg4[%c0_13, %c0_14], %23 {strides = array<i32>} : memref<8x128xbf16, #tpu.memory_space<vmem>>, vector<8x128xbf16>,
    return
  }
  func.func @transform_0(%arg0: i32) -> (i32, i32) {
    %c0_i32 = arith.constant 0 : i32
    %c0_i32_0 = arith.constant 0 : i32
    return %arg0, %c0_i32 : i32, i32
  }
  func.func @transform_1(%arg0: i32) -> (i32, i32) {
    %c0_i32 = arith.constant 0 : i32
    %c0_i32_0 = arith.constant 0 : i32
    %c0_i32_1 = arith.constant 0 : i32
    return %c0_i32, %c0_i32_0 : i32, i32
  }
  func.func @transform_2(%arg0: i32) -> (i32, i32) {
    %c0_i32 = arith.constant 0 : i32
    %c0_i32_0 = arith.constant 0 : i32
    %c0_i32_1 = arith.constant 0 : i32
    return %c0_i32, %c0_i32_0 : i32, i32
  }
  func.func @transform_3(%arg0: i32) -> (i32, i32) {
    %c0_i32 = arith.constant 0 : i32
    %c0_i32_0 = arith.constant 0 : i32
    return %arg0, %c0_i32 : i32, i32
  }
}

</mosaic_0001>

<bundles_post_ra>
// kernel: tpu_custom_call.1
= control target key start
LH: loop header
LB: loop body
LE: loop exit
PB: predicated region body
PF: predicated region fallthrough
CT: control target
= control target key end

     0   :  { %8 = vsyncpa [#allocation3], 0  ;;  %s697_s0 = inlined_call_operand.hbm [shape: f32[8,100], index: 0, kind: input, shape index: {}]   ;;  %s698_s1 = inlined_call_operand.hbm [shape: bf16[384,128], index: 1, kind: input, shape index: {}]   ;;  %s699_s2 = inlined_call_operand.hbm [shape: f32[8,128], index: 2, kind: input, shape index: {}]   ;;  %s700_s3 = inlined_call_operand.hbm [shape: bf16[8,128], index: 3, kind: output, shape index: {}]  }
   0x1   :  { %9 = vsyncpa [#allocation6], 0 }
   0x2   :  { %10 = vsyncpa [#allocation4], 0  ;;  %s628_s12 = smov [#allocation5]  }
   0x3   :  { %s26_s13 = sshll.u32 %s628_s12, 4  ;;  %s27_s13 = int_to_ptr.vmem [resolvable:$true] %s26_s13 }
   0x4   :  { %s550_s14 = scalar_lea.vmem %s27_s13, 3072  ;;  %p555_p1 = scmp.lt.s32.totalorder %s27_s13, %s27_s13 }
   0x5   :  { %p551_p0 = scmp.ne.s32.totalorder %s27_s13, %s550_s14  ;;  %p556_p2 = scmp.lt.s32.totalorder %s550_s14, %s550_s14 }
   0x7   :  { %p557_p3 = por %p556_p2, %p555_p1 }
   0x9   :  { %p558_p4 = pnand %p557_p3, %p551_p0 }
   0xb   :  { %561 = shalt.err (!%p558_p4)
}
   0xc   :  { %s629_s15 = smov 64   ;;  %s630_s16 = smov 4  }
   0xd   :  { %32 = dma.hbm_to_vmem [thread:$0]  %s698_s1, 3072, %s27_s13, [#allocation6], %s629_s15, %s629_s15, %s630_s16  }
   0xe   :  { %s631_s19 = smov [#allocation2]   ;;  %s632_s21 = smov [#allocation7]  }
   0xf   :  { %s17_s20 = sshll.u32 %s631_s19, 4  ;;  %s39_s22 = sshll.u32 %s632_s21, 4  ;;  %s18_s20 = int_to_ptr.vmem [resolvable:$true] %s17_s20  ;;  %s40_s22 = int_to_ptr.vmem [resolvable:$true] %s39_s22 }
  0x10   :  { %s570_s23 = scalar_lea.vmem %s18_s20, 128  ;;  %p575_p6 = scmp.lt.s32.totalorder %s18_s20, %s18_s20 }
  0x11   :  { %p571_p5 = scmp.ne.s32.totalorder %s18_s20, %s570_s23  ;;  %p576_p7 = scmp.lt.s32.totalorder %s570_s23, %s570_s23 }
  0x13   :  { %p577_p8 = por %p576_p7, %p575_p6 }
  0x15   :  { %p578_p9 = pnand %p577_p8, %p571_p5 }
  0x17   :  { %581 = shalt.err (!%p578_p9)
}
  0x18   :  { %20 = dma.hbm_to_vmem [thread:$0]  %s697_s0, 128, %s18_s20, [#allocation3]  }
  0x19   :  { %s590_s26 = scalar_lea.vmem %s40_s22, 128  ;;  %p595_p11 = scmp.lt.s32.totalorder %s40_s22, %s40_s22 }
  0x1a   :  { %p591_p10 = scmp.ne.s32.totalorder %s40_s22, %s590_s26  ;;  %p596_p12 = scmp.lt.s32.totalorder %s590_s26, %s590_s26 }
  0x1c   :  { %p597_p13 = por %p596_p12, %p595_p11 }
  0x1e   :  { %p598_p0 = pnand %p597_p13, %p591_p10 }
  0x20   :  { %601 = shalt.err (!%p598_p0)
}
  0x21   :  { %42 = dma.hbm_to_vmem [thread:$0]  %s699_s2, 128, %s40_s22, [#allocation6]  }
  0x22   :  { %622 = dma.done.wait [#allocation3], 128  }
  0x23   :  { %623 = vsyncadd [#allocation3], 4294967168 }
  0x24   :  { %624 = dma.done.wait [#allocation6], 3200  }
  0x25   :  { %625 = vsyncadd [#allocation6], 4294964096  ;;  %v633_v0 = vmov 0.0   ;;  %vm634_vm0 = vmmov 0   ;;  %vm150_vm1 = vcmask 1041408   ;;  %v520_v3 = vld [vmem:[#allocation5 + $0x28] sm:$0xff]  }
  0x26   :  { %453 = vmatprep.subr.bf16.mxu0 %v633_v0  ;;  %467 = vmatprep.mubr.msk.bf16.mxu0 %vm634_vm0, %v633_v0  ;;  %v519_v1 = vld [vmem:[#allocation5 + $0x30] ss:$0 sps:$4 sm:$0x33]   ;;  %v521_v4 = vld [vmem:[#allocation5 + $0x20] sm:$0xff]   ;;  %v526_v5 = vld [vmem:[#allocation5 + $0x78] sm:$0xff]   ;;  %vm146_vm2 = vcmask 818176  }
  0x27   :  { %471 = vmatprep.subr.bf16.mxu1 %v633_v0  ;;  %487 = vmatprep.mubr.msk.bf16.mxu1 %vm634_vm0, %v633_v0  ;;  %v152_v2 = vsel %vm150_vm1, %v519_v1, 0  ;;  %v527_v6 = vld [vmem:[#allocation5 + $0x70] sm:$0xff]   ;;  %v522_v7 = vld [vmem:[#allocation5 + $0x18] sm:$0xff]   ;;  %v528_v9 = vld [vmem:[#allocation5 + $0x68] sm:$0xff]   ;;  %s635_s0 = smov [#allocation8]  }
  0x28   :  { %454 = vmatpush3.bf16.msra.mxu0 %v152_v2  ;;  %472 = vmatpush3.bf16.msra.mxu1 %v526_v5  ;;  %v523_v8 = vld [vmem:[#allocation5 + $0x10] sm:$0xff]   ;;  %v529_v10 = vld [vmem:[#allocation5 + $0x60] sm:$0xff]   ;;  %v524_v11 = vld [vmem:[#allocation5 + $0x8] sm:$0xff]   ;;  %s390_s2 = sshll.u32 %s635_s0, 4  ;;  %s391_s2 = int_to_ptr.vmem [resolvable:$true] %s390_s2 }
  0x29   :  { %455 = vmatprep.subr.bf16.mxu0 %v633_v0  ;;  %473 = vmatprep.subr.bf16.mxu1 %v633_v0  ;;  %v530_v12 = vld [vmem:[#allocation5 + $0x58] sm:$0xff]   ;;  %v525_v13 = vld [vmem:[#allocation5] sm:$0xff]   ;;  %v531_v15 = vld [vmem:[#allocation5 + $0x50] sm:$0xff]   ;;  %s602_s28 = scalar_lea.vmem %s391_s2, 64  ;;  %p607_p2 = scmp.lt.s32.totalorder %s391_s2, %s391_s2 }
  0x2a   :  { %v53_v14 = vld [vmem:[#allocation2] sm:$0xff]  ;;  %v532_v17 = vld [vmem:[#allocation5 + $0x48] sm:$0xff]   ;;  %v533_v18 = vld [vmem:[#allocation5 + $0x40] sm:$0xff]   ;;  %p603_p1 = scmp.ne.s32.totalorder %s391_s2, %s602_s28  ;;  %p608_p3 = scmp.lt.s32.totalorder %s602_s28, %s602_s28 }
  0x2b   :  { %v54_v16 = vpack.c.bf16 %v53_v14, %v53_v14  ;;  %v534_v19 = vld [vmem:[#allocation5 + $0xb8] sm:$0xff]   ;;  %v535_v20 = vld [vmem:[#allocation5 + $0xb0] sm:$0xff]   ;;  %v536_v21 = vld [vmem:[#allocation5 + $0xa8] sm:$0xff]  }
  0x2c   :  { %456 = vmatpush3.bf16.msra.mxu0 %v520_v3  ;;  %474 = vmatpush3.bf16.msra.mxu1 %v527_v6  ;;  %v537_v22 = vld [vmem:[#allocation5 + $0xa0] sm:$0xff]   ;;  %v538_v23 = vld [vmem:[#allocation5 + $0x98] sm:$0xff]   ;;  %v539_v24 = vld [vmem:[#allocation5 + $0x90] sm:$0xff]   ;;  %p609_p4 = por %p608_p3, %p607_p2 }
  0x2d   :  { %457 = vmatprep.subr.bf16.mxu0 %v633_v0  ;;  %475 = vmatprep.subr.bf16.mxu1 %v633_v0  ;;  %v400_v25 = vld [vmem:[#allocation7] ss:$0 sm:$0xff]  ;;  %v540_v33 = vld [vmem:[#allocation5 + $0x88] sm:$0xff]   ;;  %v409_v35 = vld [vmem:[#allocation7 + $0x1] ss:$0 sm:$0xff] }
  0x2e   :  { %v541_v34 = vld [vmem:[#allocation5 + $0x80] sm:$0xff]   ;;  %p610_p5 = pnand %p609_p4, %p603_p1 }
  0x2f   :  { %v418_v43 = vld [vmem:[#allocation7 + $0x2] ss:$0 sm:$0xff] }
  0x30   :  { %458 = vmatpush3.bf16.msra.mxu0 %v521_v4  ;;  %476 = vmatpush3.bf16.msra.mxu1 %v528_v9 }
  0x31   :  { %459 = vmatprep.subr.bf16.mxu0 %v633_v0  ;;  %477 = vmatprep.subr.bf16.mxu1 %v633_v0 }
  0x34   :  { %460 = vmatpush3.bf16.msra.mxu0 %v522_v7  ;;  %478 = vmatpush3.bf16.msra.mxu1 %v529_v10 }
  0x35   :  { %461 = vmatprep.subr.bf16.mxu0 %v633_v0  ;;  %479 = vmatprep.subr.bf16.mxu1 %v633_v0 }
  0x38   :  { %462 = vmatpush3.bf16.msra.mxu0 %v523_v8  ;;  %480 = vmatpush3.bf16.msra.mxu1 %v530_v12 }
  0x39   :  { %463 = vmatprep.subr.bf16.mxu0 %v633_v0  ;;  %481 = vmatprep.subr.bf16.mxu1 %v633_v0 }
  0x3c   :  { %464 = vmatpush3.bf16.msra.mxu0 %v524_v11  ;;  %482 = vmatpush3.bf16.msra.mxu1 %v531_v15 }
  0x3d   :  { %465 = vmatprep.subr.bf16.mxu0 %v633_v0  ;;  %483 = vmatprep.subr.bf16.mxu1 %v633_v0 }
  0x40   :  { %466 = vmatpush3.bf16.msra.mxu0 %v525_v13  ;;  %484 = vmatpush3.bf16.msra.mxu1 %v532_v17 }
  0x41   :  { %491 = vmatprep.subr.bf16.mxu0 %v633_v0  ;;  %485 = vmatprep.subr.bf16.mxu1 %v633_v0 }
  0x43   :  { %468 = vmatmul.mubr.msk.bf16.vlgmr.msra.gmra.mxu0 %vm146_vm2, %v54_v16 }
  0x44   :  { %507 = vmatprep.mubr.msk.bf16.mxu0 %vm634_vm0, %v633_v0  ;;  %486 = vmatpush3.bf16.msra.mxu1 %v533_v18 }
  0x45   :  { %492 = vmatpush3.bf16.msra.mxu0 %v534_v19 }
  0x46   :  { %493 = vmatprep.subr.bf16.mxu0 %v633_v0 }
  0x49   :  { %494 = vmatpush3.bf16.msra.mxu0 %v535_v20 }
  0x4a   :  { %495 = vmatprep.subr.bf16.mxu0 %v633_v0 }
  0x4d   :  { %496 = vmatpush3.bf16.msra.mxu0 %v536_v21 }
  0x4e   :  { %497 = vmatprep.subr.bf16.mxu0 %v633_v0 }
  0x51   :  { %498 = vmatpush3.bf16.msra.mxu0 %v537_v22 }
  0x52   :  { %499 = vmatprep.subr.bf16.mxu0 %v633_v0 }
  0x55   :  { %500 = vmatpush3.bf16.msra.mxu0 %v538_v23 }
  0x56   :  { %501 = vmatprep.subr.bf16.mxu0 %v633_v0 }
  0x59   :  { %502 = vmatpush3.bf16.msra.mxu0 %v539_v24 }
  0x5a   :  { %503 = vmatprep.subr.bf16.mxu0 %v633_v0 }
  0x5d   :  { %504 = vmatpush3.bf16.msra.mxu0 %v540_v33 }
  0x5e   :  { %505 = vmatprep.subr.bf16.mxu0 %v633_v0 }
  0x61   :  { %506 = vmatpush3.bf16.msra.mxu0 %v541_v34 }
 0x103   :  { %v188_v26 = vpop.f32.mrf.mxu0 }
 0x104   :  { %v189_v27 = vadd.f32 %v400_v25, %v188_v26 }
 0x105   :  { %v469_v28 = vpop.f32.mrf.mxu0 }
 0x106   :  { %v194_v29 = vmax.f32 %v189_v27, 0.0 }
 0x107   :  { %v191_v30 = vpop.f32.mrf.mxu0 }
 0x108   :  { %v195_v31 = vpack.c.bf16 %v194_v29, %v194_v29 }
 0x109   :  { %v470_v32 = vpop.f32.mrf.mxu0 }
 0x10a   :  { %488 = vmatmul.mubr.bf16.vlgmr.msra.gmra.mxu1 %v195_v31 }
 0x1ca   :  { %v282_v36 = vpop.f32.mrf.mxu1 }
 0x1cb   :  { %v283_v37 = vadd.f32 %v409_v35, %v282_v36 }
 0x1cc   :  { %v489_v38 = vpop.f32.mrf.mxu1 }
 0x1cd   :  { %v288_v39 = vmax.f32 %v283_v37, 0.0 }
 0x1ce   :  { %v285_v40 = vpop.f32.mrf.mxu1 }
 0x1cf   :  { %v289_v41 = vpack.c.bf16 %v288_v39, %v288_v39 }
 0x1d0   :  { %v490_v42 = vpop.f32.mrf.mxu1 }
 0x1d1   :  { %508 = vmatmul.mubr.bf16.vlgmr.msra.gmra.mxu0 %v289_v41 }
 0x291   :  { %v376_v44 = vpop.f32.mrf.mxu0 }
 0x292   :  { %v377_v45 = vadd.f32 %v418_v43, %v376_v44 }
 0x293   :  { %v509_v46 = vpop.f32.mrf.mxu0 }
 0x294   :  { %v382_v47 = vpack.c.bf16 %v377_v45, %v377_v45 }
 0x295   :  { %v379_v48 = vpop.f32.mrf.mxu0 }
 0x296   :  { %383 = vst [vmem:[#allocation8] sm:$0xf] %v382_v47 }
 0x297   :  { %v510_v49 = vpop.f32.mrf.mxu0 }
 0x298   :  { %613 = shalt.err (!%p610_p5)
}
 0x299   :  { %393 = dma.vmem_to_hbm [thread:$0]  %s391_s2, 64, %s700_s3, [#allocation4]  }
 0x29a   :  { %626 = dma.done.wait [#allocation4], 64  }
 0x29b   :  { %627 = vsyncadd [#allocation4], 4294967232 }
 0x29c   :  { %397 = vsyncpa [#allocation3], 1 }
 0x29d   :  { %398 = vsyncpa [#allocation6], 1 }
 0x29e   :  { %399 = vsyncpa [#allocation4], 1 }

</bundles_post_ra>
